<compile_context>
chip_gen: v7x
topology: tpu7x:2x2x1
jax: 0.10.0
libtpu: 0.0.40
codegen_flags: <defaults>
</compile_context>

<pallas_src>
import math

import jax
import jax.numpy as jnp
from jax import lax
from jax.experimental import pallas as pl
from jax.experimental.pallas import tpu as pltpu


def _attn_chain_kernel(x1_ref, x2_ref, x3_ref,
                       x4_hbm, x5_hbm, x6_hbm, x7_hbm, x8_hbm, x9_hbm,
                       o_ref,
                       k2_buf, v2_buf, k3_buf, v3_buf, k4_buf, v4_buf,
                       sems):
    """Fused chain of 4 single-head SDPAs; intermediates never leave vregs.

    Stage-1 K/V arrive via the normal BlockSpec DMA; stage-2/3/4 K/V are
    fetched manually so their copies overlap earlier-stage compute.
    """
    # Kick off all later-stage K/V fetches immediately.
    copies = [
        pltpu.make_async_copy(x4_hbm, k2_buf, sems.at[0]),
        pltpu.make_async_copy(x5_hbm, v2_buf, sems.at[1]),
        pltpu.make_async_copy(x6_hbm, k3_buf, sems.at[2]),
        pltpu.make_async_copy(x7_hbm, v3_buf, sems.at[3]),
        pltpu.make_async_copy(x8_hbm, k4_buf, sems.at[4]),
        pltpu.make_async_copy(x9_hbm, v4_buf, sems.at[5]),
    ]
    for cp in copies:
        cp.start()

    def sdpa(q, k_ref, v_ref):
        k = k_ref[0]                                   # (Lk, D)
        v = v_ref[0]                                   # (Lk, D)
        scale = 1.0 / math.sqrt(q.shape[-1])
        # Contract over D directly (no k^T materialization); bf16 MXU operands,
        # f32 accumulation.
        s = lax.dot_general(
            q.astype(jnp.bfloat16), k.astype(jnp.bfloat16),
            dimension_numbers=(((1,), (1,)), ((), ())),
            preferred_element_type=jnp.float32) * scale          # (Lq, Lk) f32
        # Numerically-stable softmax along the key axis, normalization deferred.
        m = jnp.max(s, axis=-1, keepdims=True)
        p = jnp.exp(s - m)                                       # f32, VPU/EUP
        denom = jnp.sum(p, axis=-1, keepdims=True)               # XLU, off MXU path
        acc = jnp.dot(p.astype(jnp.bfloat16), v.astype(jnp.bfloat16),
                      preferred_element_type=jnp.float32)        # (Lq, D) f32
        return acc * pl.reciprocal(denom, approx=True)           # EUP vrcp

    q = x1_ref[0].astype(jnp.float32)

    # Stage 1: K/V already in VMEM (BlockSpec DMA).
    q = sdpa(q, x2_ref, x3_ref)

    # Stage 2: wait only for its own K/V copies.
    copies[0].wait()
    copies[1].wait()
    q = sdpa(q, k2_buf, v2_buf)

    # Stage 3.
    copies[2].wait()
    copies[3].wait()
    q = sdpa(q, k3_buf, v3_buf)

    # Stage 4.
    copies[4].wait()
    copies[5].wait()
    q = sdpa(q, k4_buf, v4_buf)

    o_ref[0] = q.astype(o_ref.dtype)


@jax.jit
def model_forward(x1, x2, x3, x4, x5, x6, x7, x8, x9):
    xs = (x1, x2, x3, x4, x5, x6, x7, x8, x9)
    _, Lq, D = x1.shape
    kv_lens = (x2.shape[1], x4.shape[1], x6.shape[1], x8.shape[1])

    # Advisory cost hint: 2 matmuls (2*Lq*Lk*D flops each) + one exp per score.
    flops = sum(4 * Lq * lk * D for lk in kv_lens)
    transcendentals = sum(Lq * lk for lk in kv_lens)
    bytes_accessed = (sum(int(x.size) * x.dtype.itemsize for x in xs)
                      + Lq * D * x1.dtype.itemsize)

    vmem = pl.BlockSpec(memory_space=pltpu.MemorySpace.VMEM)
    hbm = pl.BlockSpec(memory_space=pl.ANY)   # manual DMA inside the kernel

    return pl.pallas_call(
        _attn_chain_kernel,
        out_shape=jax.ShapeDtypeStruct((1, Lq, D), x1.dtype),
        in_specs=[vmem, vmem, vmem, hbm, hbm, hbm, hbm, hbm, hbm],
        out_specs=vmem,
        scratch_shapes=[
            pltpu.VMEM(x4.shape, x4.dtype),   # k2_buf
            pltpu.VMEM(x5.shape, x5.dtype),   # v2_buf
            pltpu.VMEM(x6.shape, x6.dtype),   # k3_buf
            pltpu.VMEM(x7.shape, x7.dtype),   # v3_buf
            pltpu.VMEM(x8.shape, x8.dtype),   # k4_buf
            pltpu.VMEM(x9.shape, x9.dtype),   # v4_buf
            pltpu.SemaphoreType.DMA((6,)),
        ],
        cost_estimate=pl.CostEstimate(
            flops=flops,
            transcendentals=transcendentals,
            bytes_accessed=bytes_accessed),
    )(*xs)


def _reference(x1, x2, x3, x4, x5, x6, x7, x8, x9):
    def ref_sdpa(q, k, v):
        s = jnp.einsum("bqd,bkd->bqk", q, k) / math.sqrt(q.shape[-1])
        p = jax.nn.softmax(s, axis=-1)
        return jnp.einsum("bqk,bkd->bqd", p, v)

    q = ref_sdpa(x1, x2, x3)
    l = ref_sdpa(q, x4, x5)
    m = ref_sdpa(l, x6, x7)
    return ref_sdpa(m, x8, x9)


if __name__ == "__main__":
    key = jax.random.PRNGKey(0)
    D = 128  # unified feature dim (lane-aligned)
    shapes = [
        (1, 16, D),  # x1 (query)
        (1, 24, D),  # x2 (key)
        (1, 24, D),  # x3 (value)
        (1, 28, D),  # x4
        (1, 28, D),  # x5
        (1, 32, D),  # x6
        (1, 32, D),  # x7
        (1, 36, D),  # x8
        (1, 36, D),  # x9
    ]
    keys = jax.random.split(key, len(shapes))
    xs = [
        jax.random.uniform(k, s, dtype=jnp.float32)  # mimic torch.rand
        for k, s in zip(keys, shapes)
    ]

    out = jax.block_until_ready(model_forward(*xs))
    ref = _reference(*xs)

    assert out.shape == (1, 16, D), out.shape
    # bf16 MXU operands (f32 accumulation) + approx reciprocal (EUP) across 4
    # chained stages trade a few extra ULPs vs the pure-f32 reference.
    assert jnp.allclose(out, ref, atol=2e-2, rtol=2e-2), "mismatch vs reference"

    print("KERNEL_OK")
</pallas_src>

<mosaic_0001>
module attributes {stable_mosaic.version = 11 : i64} {
  func.func @_attn_chain_kernel(%arg0: memref<1x16x128xf32, #tpu.memory_space<vmem>>, %arg1: memref<1x24x128xf32, #tpu.memory_space<vmem>>, %arg2: memref<1x24x128xf32, #tpu.memory_space<vmem>>, %arg3: memref<1x28x128xf32, #tpu.memory_space<any>>, %arg4: memref<1x28x128xf32, #tpu.memory_space<any>>, %arg5: memref<1x32x128xf32, #tpu.memory_space<any>>, %arg6: memref<1x32x128xf32, #tpu.memory_space<any>>, %arg7: memref<1x36x128xf32, #tpu.memory_space<any>>, %arg8: memref<1x36x128xf32, #tpu.memory_space<any>>, %arg9: memref<1x16x128xf32, #tpu.memory_space<vmem>>, %arg10: memref<1x28x128xf32, #tpu.memory_space<vmem>>, %arg11: memref<1x28x128xf32, #tpu.memory_space<vmem>>, %arg12: memref<1x32x128xf32, #tpu.memory_space<vmem>>, %arg13: memref<1x32x128xf32, #tpu.memory_space<vmem>>, %arg14: memref<1x36x128xf32, #tpu.memory_space<vmem>>, %arg15: memref<1x36x128xf32, #tpu.memory_space<vmem>>, %arg16: memref<6x!tpu.dma_semaphore, #tpu.memory_space<semaphore_mem>>) attributes {dimension_semantics = [], scalar_prefetch = 0 : i64, scratch_operands = 7 : i64, tpu.core_type = #tpu.core_type<tc>} {
    %c0_i32 = arith.constant 0 : i32
    %0 = tpu.memref_slice %arg16[%c0_i32] : memref<6x!tpu.dma_semaphore, #tpu.memory_space<semaphore_mem>> -> memref<1x!tpu.dma_semaphore, #tpu.memory_space<semaphore_mem>>
    %1 = tpu.memref_squeeze %0 : memref<1x!tpu.dma_semaphore, #tpu.memory_space<semaphore_mem>> -> memref<!tpu.dma_semaphore, #tpu.memory_space<semaphore_mem>>
    tpu.enqueue_dma source(%arg3 : memref<1x28x128xf32, #tpu.memory_space<any>>) target(%arg10 : memref<1x28x128xf32, #tpu.memory_space<vmem>>) target_semaphore(%1 : memref<!tpu.dma_semaphore, #tpu.memory_space<semaphore_mem>>)
    %c1_i32 = arith.constant 1 : i32
    %2 = tpu.memref_slice %arg16[%c1_i32] : memref<6x!tpu.dma_semaphore, #tpu.memory_space<semaphore_mem>> -> memref<1x!tpu.dma_semaphore, #tpu.memory_space<semaphore_mem>>
    %3 = tpu.memref_squeeze %2 : memref<1x!tpu.dma_semaphore, #tpu.memory_space<semaphore_mem>> -> memref<!tpu.dma_semaphore, #tpu.memory_space<semaphore_mem>>
    tpu.enqueue_dma source(%arg4 : memref<1x28x128xf32, #tpu.memory_space<any>>) target(%arg11 : memref<1x28x128xf32, #tpu.memory_space<vmem>>) target_semaphore(%3 : memref<!tpu.dma_semaphore, #tpu.memory_space<semaphore_mem>>)
    %c2_i32 = arith.constant 2 : i32
    %4 = tpu.memref_slice %arg16[%c2_i32] : memref<6x!tpu.dma_semaphore, #tpu.memory_space<semaphore_mem>> -> memref<1x!tpu.dma_semaphore, #tpu.memory_space<semaphore_mem>>
    %5 = tpu.memref_squeeze %4 : memref<1x!tpu.dma_semaphore, #tpu.memory_space<semaphore_mem>> -> memref<!tpu.dma_semaphore, #tpu.memory_space<semaphore_mem>>
    tpu.enqueue_dma source(%arg5 : memref<1x32x128xf32, #tpu.memory_space<any>>) target(%arg12 : memref<1x32x128xf32, #tpu.memory_space<vmem>>) target_semaphore(%5 : memref<!tpu.dma_semaphore, #tpu.memory_space<semaphore_mem>>)
    %c3_i32 = arith.constant 3 : i32
    %6 = tpu.memref_slice %arg16[%c3_i32] : memref<6x!tpu.dma_semaphore, #tpu.memory_space<semaphore_mem>> -> memref<1x!tpu.dma_semaphore, #tpu.memory_space<semaphore_mem>>
    %7 = tpu.memref_squeeze %6 : memref<1x!tpu.dma_semaphore, #tpu.memory_space<semaphore_mem>> -> memref<!tpu.dma_semaphore, #tpu.memory_space<semaphore_mem>>
    tpu.enqueue_dma source(%arg6 : memref<1x32x128xf32, #tpu.memory_space<any>>) target(%arg13 : memref<1x32x128xf32, #tpu.memory_space<vmem>>) target_semaphore(%7 : memref<!tpu.dma_semaphore, #tpu.memory_space<semaphore_mem>>)
    %c4_i32 = arith.constant 4 : i32
    %8 = tpu.memref_slice %arg16[%c4_i32] : memref<6x!tpu.dma_semaphore, #tpu.memory_space<semaphore_mem>> -> memref<1x!tpu.dma_semaphore, #tpu.memory_space<semaphore_mem>>
    %9 = tpu.memref_squeeze %8 : memref<1x!tpu.dma_semaphore, #tpu.memory_space<semaphore_mem>> -> memref<!tpu.dma_semaphore, #tpu.memory_space<semaphore_mem>>
    tpu.enqueue_dma source(%arg7 : memref<1x36x128xf32, #tpu.memory_space<any>>) target(%arg14 : memref<1x36x128xf32, #tpu.memory_space<vmem>>) target_semaphore(%9 : memref<!tpu.dma_semaphore, #tpu.memory_space<semaphore_mem>>)
    %c5_i32 = arith.constant 5 : i32
    %10 = tpu.memref_slice %arg16[%c5_i32] : memref<6x!tpu.dma_semaphore, #tpu.memory_space<semaphore_mem>> -> memref<1x!tpu.dma_semaphore, #tpu.memory_space<semaphore_mem>>
    %11 = tpu.memref_squeeze %10 : memref<1x!tpu.dma_semaphore, #tpu.memory_space<semaphore_mem>> -> memref<!tpu.dma_semaphore, #tpu.memory_space<semaphore_mem>>
    tpu.enqueue_dma source(%arg8 : memref<1x36x128xf32, #tpu.memory_space<any>>) target(%arg15 : memref<1x36x128xf32, #tpu.memory_space<vmem>>) target_semaphore(%11 : memref<!tpu.dma_semaphore, #tpu.memory_space<semaphore_mem>>)
    %c0 = arith.constant 0 : index
    %c0_0 = arith.constant 0 : index
    %c0_1 = arith.constant 0 : index
    %12 = vector.load %arg0[%c0, %c0_0, %c0_1] : memref<1x16x128xf32, #tpu.memory_space<vmem>>, vector<1x16x128xf32>
    %13 = vector.shape_cast %12 : vector<1x16x128xf32> to vector<16x128xf32>
    %c0_2 = arith.constant 0 : index
    %c0_3 = arith.constant 0 : index
    %c0_4 = arith.constant 0 : index
    %14 = vector.load %arg1[%c0_2, %c0_3, %c0_4] : memref<1x24x128xf32, #tpu.memory_space<vmem>>, vector<1x24x128xf32>
    %15 = vector.shape_cast %14 : vector<1x24x128xf32> to vector<24x128xf32>
    %c0_5 = arith.constant 0 : index
    %c0_6 = arith.constant 0 : index
    %c0_7 = arith.constant 0 : index
    %16 = vector.load %arg2[%c0_5, %c0_6, %c0_7] : memref<1x24x128xf32, #tpu.memory_space<vmem>>, vector<1x24x128xf32>
    %17 = vector.shape_cast %16 : vector<1x24x128xf32> to vector<24x128xf32>
    %18 = arith.truncf %13 : vector<16x128xf32> to vector<16x128xbf16>
    %19 = arith.truncf %15 : vector<24x128xf32> to vector<24x128xbf16>
    %cst = arith.constant dense<0.000000e+00> : vector<16x24xf32>
    %20 = tpu.matmul %18, %19, %cst {dimension_numbers = #tpu.dot_dimension_numbers<[1], [1], [0], [0], [0, 0, 1, 0], [], []>} : vector<16x128xbf16>, vector<24x128xbf16>, vector<16x24xf32> -> vector<16x24xf32>
    %cst_8 = arith.constant 0.0883883461 : f32
    %21 = vector.broadcast %cst_8 : f32 to vector<16x24xf32>
    %22 = arith.mulf %20, %21 : vector<16x24xf32>
    %cst_9 = arith.constant dense<0xFF800000> : vector<16xf32>
    %23 = vector.multi_reduction <maximumf>, %22, %cst_9 [1] : vector<16x24xf32> to vector<16xf32>
    %24 = vector.shape_cast %23 : vector<16xf32> to vector<16x1xf32>
    %25 = vector.broadcast %24 : vector<16x1xf32> to vector<16x24xf32>
    %26 = arith.subf %22, %25 : vector<16x24xf32>
    %27 = math.exp %26 : vector<16x24xf32>
    %cst_10 = arith.constant dense<0.000000e+00> : vector<16xf32>
    %28 = vector.multi_reduction <add>, %27, %cst_10 [1] : vector<16x24xf32> to vector<16xf32>
    %29 = vector.shape_cast %28 : vector<16xf32> to vector<16x1xf32>
    %30 = arith.truncf %27 : vector<16x24xf32> to vector<16x24xbf16>
    %31 = arith.truncf %17 : vector<24x128xf32> to vector<24x128xbf16>
    %cst_11 = arith.constant dense<0.000000e+00> : vector<16x128xf32>
    %32 = tpu.matmul %30, %31, %cst_11 {dimension_numbers = #tpu.dot_dimension_numbers<[1], [0], [0], [1], [0, 0, 1, 1], [], []>} : vector<16x24xbf16>, vector<24x128xbf16>, vector<16x128xf32> -> vector<16x128xf32>
    %33 = tpu.reciprocal %29 {approx = true} : vector<16x1xf32> -> vector<16x1xf32>
    %34 = vector.broadcast %33 : vector<16x1xf32> to vector<16x128xf32>
    %35 = arith.mulf %32, %34 : vector<16x128xf32>
    %c0_i32_12 = arith.constant 0 : i32
    %36 = tpu.memref_slice %arg16[%c0_i32_12] : memref<6x!tpu.dma_semaphore, #tpu.memory_space<semaphore_mem>> -> memref<1x!tpu.dma_semaphore, #tpu.memory_space<semaphore_mem>>
    %37 = tpu.memref_squeeze %36 : memref<1x!tpu.dma_semaphore, #tpu.memory_space<semaphore_mem>> -> memref<!tpu.dma_semaphore, #tpu.memory_space<semaphore_mem>>
    tpu.wait_dma2 semaphore(%37 : memref<!tpu.dma_semaphore, #tpu.memory_space<semaphore_mem>>) src(%arg3 : memref<1x28x128xf32, #tpu.memory_space<any>>) dst(%arg10 : memref<1x28x128xf32, #tpu.memory_space<vmem>>)
    %c1_i32_13 = arith.constant 1 : i32
    %38 = tpu.memref_slice %arg16[%c1_i32_13] : memref<6x!tpu.dma_semaphore, #tpu.memory_space<semaphore_mem>> -> memref<1x!tpu.dma_semaphore, #tpu.memory_space<semaphore_mem>>
    %39 = tpu.memref_squeeze %38 : memref<1x!tpu.dma_semaphore, #tpu.memory_space<semaphore_mem>> -> memref<!tpu.dma_semaphore, #tpu.memory_space<semaphore_mem>>
    tpu.wait_dma2 semaphore(%39 : memref<!tpu.dma_semaphore, #tpu.memory_space<semaphore_mem>>) src(%arg4 : memref<1x28x128xf32, #tpu.memory_space<any>>) dst(%arg11 : memref<1x28x128xf32, #tpu.memory_space<vmem>>)
    %c0_14 = arith.constant 0 : index
    %c0_15 = arith.constant 0 : index
    %c0_16 = arith.constant 0 : index
    %40 = vector.load %arg10[%c0_14, %c0_15, %c0_16] : memref<1x28x128xf32, #tpu.memory_space<vmem>>, vector<1x28x128xf32>
    %41 = vector.shape_cast %40 : vector<1x28x128xf32> to vector<28x128xf32>
    %c0_17 = arith.constant 0 : index
    %c0_18 = arith.constant 0 : index
    %c0_19 = arith.constant 0 : index
    %42 = vector.load %arg11[%c0_17, %c0_18, %c0_19] : memref<1x28x128xf32, #tpu.memory_space<vmem>>, vector<1x28x128xf32>
    %43 = vector.shape_cast %42 : vector<1x28x128xf32> to vector<28x128xf32>
    %44 = arith.truncf %35 : vector<16x128xf32> to vector<16x128xbf16>
    %45 = arith.truncf %41 : vector<28x128xf32> to vector<28x128xbf16>
    %cst_20 = arith.constant dense<0.000000e+00> : vector<16x28xf32>
    %46 = tpu.matmul %44, %45, %cst_20 {dimension_numbers = #tpu.dot_dimension_numbers<[1], [1], [0], [0], [0, 0, 1, 0], [], []>} : vector<16x128xbf16>, vector<28x128xbf16>, vector<16x28xf32> -> vector<16x28xf32>
    %cst_21 = arith.constant 0.0883883461 : f32
    %47 = vector.broadcast %cst_21 : f32 to vector<16x28xf32>
    %48 = arith.mulf %46, %47 : vector<16x28xf32>
    %cst_22 = arith.constant dense<0xFF800000> : vector<16xf32>
    %49 = vector.multi_reduction <maximumf>, %48, %cst_22 [1] : vector<16x28xf32> to vector<16xf32>
    %50 = vector.shape_cast %49 : vector<16xf32> to vector<16x1xf32>
    %51 = vector.broadcast %50 : vector<16x1xf32> to vector<16x28xf32>
    %52 = arith.subf %48, %51 : vector<16x28xf32>
    %53 = math.exp %52 : vector<16x28xf32>
    %cst_23 = arith.constant dense<0.000000e+00> : vector<16xf32>
    %54 = vector.multi_reduction <add>, %53, %cst_23 [1] : vector<16x28xf32> to vector<16xf32>
    %55 = vector.shape_cast %54 : vector<16xf32> to vector<16x1xf32>
    %56 = arith.truncf %53 : vector<16x28xf32> to vector<16x28xbf16>
    %57 = arith.truncf %43 : vector<28x128xf32> to vector<28x128xbf16>
    %cst_24 = arith.constant dense<0.000000e+00> : vector<16x128xf32>
    %58 = tpu.matmul %56, %57, %cst_24 {dimension_numbers = #tpu.dot_dimension_numbers<[1], [0], [0], [1], [0, 0, 1, 1], [], []>} : vector<16x28xbf16>, vector<28x128xbf16>, vector<16x128xf32> -> vector<16x128xf32>
    %59 = tpu.reciprocal %55 {approx = true} : vector<16x1xf32> -> vector<16x1xf32>
    %60 = vector.broadcast %59 : vector<16x1xf32> to vector<16x128xf32>
    %61 = arith.mulf %58, %60 : vector<16x128xf32>
    %c2_i32_25 = arith.constant 2 : i32
    %62 = tpu.memref_slice %arg16[%c2_i32_25] : memref<6x!tpu.dma_semaphore, #tpu.memory_space<semaphore_mem>> -> memref<1x!tpu.dma_semaphore, #tpu.memory_space<semaphore_mem>>
    %63 = tpu.memref_squeeze %62 : memref<1x!tpu.dma_semaphore, #tpu.memory_space<semaphore_mem>> -> memref<!tpu.dma_semaphore, #tpu.memory_space<semaphore_mem>>
    tpu.wait_dma2 semaphore(%63 : memref<!tpu.dma_semaphore, #tpu.memory_space<semaphore_mem>>) src(%arg5 : memref<1x32x128xf32, #tpu.memory_space<any>>) dst(%arg12 : memref<1x32x128xf32, #tpu.memory_space<vmem>>)
    %c3_i32_26 = arith.constant 3 : i32
    %64 = tpu.memref_slice %arg16[%c3_i32_26] : memref<6x!tpu.dma_semaphore, #tpu.memory_space<semaphore_mem>> -> memref<1x!tpu.dma_semaphore, #tpu.memory_space<semaphore_mem>>
    %65 = tpu.memref_squeeze %64 : memref<1x!tpu.dma_semaphore, #tpu.memory_space<semaphore_mem>> -> memref<!tpu.dma_semaphore, #tpu.memory_space<semaphore_mem>>
    tpu.wait_dma2 semaphore(%65 : memref<!tpu.dma_semaphore, #tpu.memory_space<semaphore_mem>>) src(%arg6 : memref<1x32x128xf32, #tpu.memory_space<any>>) dst(%arg13 : memref<1x32x128xf32, #tpu.memory_space<vmem>>)
    %c0_27 = arith.constant 0 : index
    %c0_28 = arith.constant 0 : index
    %c0_29 = arith.constant 0 : index
    %66 = vector.load %arg12[%c0_27, %c0_28, %c0_29] : memref<1x32x128xf32, #tpu.memory_space<vmem>>, vector<1x32x128xf32>
    %67 = vector.shape_cast %66 : vector<1x32x128xf32> to vector<32x128xf32>
    %c0_30 = arith.constant 0 : index
    %c0_31 = arith.constant 0 : index
    %c0_32 = arith.constant 0 : index
    %68 = vector.load %arg13[%c0_30, %c0_31, %c0_32] : memref<1x32x128xf32, #tpu.memory_space<vmem>>, vector<1x32x128xf32>
    %69 = vector.shape_cast %68 : vector<1x32x128xf32> to vector<32x128xf32>
    %70 = arith.truncf %61 : vector<16x128xf32> to vector<16x128xbf16>
    %71 = arith.truncf %67 : vector<32x128xf32> to vector<32x128xbf16>
    %cst_33 = arith.constant dense<0.000000e+00> : vector<16x32xf32>
    %72 = tpu.matmul %70, %71, %cst_33 {dimension_numbers = #tpu.dot_dimension_numbers<[1], [1], [0], [0], [0, 0, 1, 0], [], []>} : vector<16x128xbf16>, vector<32x128xbf16>, vector<16x32xf32> -> vector<16x32xf32>
    %cst_34 = arith.constant 0.0883883461 : f32
    %73 = vector.broadcast %cst_34 : f32 to vector<16x32xf32>
    %74 = arith.mulf %72, %73 : vector<16x32xf32>
    %cst_35 = arith.constant dense<0xFF800000> : vector<16xf32>
    %75 = vector.multi_reduction <maximumf>, %74, %cst_35 [1] : vector<16x32xf32> to vector<16xf32>
    %76 = vector.shape_cast %75 : vector<16xf32> to vector<16x1xf32>
    %77 = vector.broadcast %76 : vector<16x1xf32> to vector<16x32xf32>
    %78 = arith.subf %74, %77 : vector<16x32xf32>
    %79 = math.exp %78 : vector<16x32xf32>
    %cst_36 = arith.constant dense<0.000000e+00> : vector<16xf32>
    %80 = vector.multi_reduction <add>, %79, %cst_36 [1] : vector<16x32xf32> to vector<16xf32>
    %81 = vector.shape_cast %80 : vector<16xf32> to vector<16x1xf32>
    %82 = arith.truncf %79 : vector<16x32xf32> to vector<16x32xbf16>
    %83 = arith.truncf %69 : vector<32x128xf32> to vector<32x128xbf16>
    %cst_37 = arith.constant dense<0.000000e+00> : vector<16x128xf32>
    %84 = tpu.matmul %82, %83, %cst_37 {dimension_numbers = #tpu.dot_dimension_numbers<[1], [0], [0], [1], [0, 0, 1, 1], [], []>} : vector<16x32xbf16>, vector<32x128xbf16>, vector<16x128xf32> -> vector<16x128xf32>
    %85 = tpu.reciprocal %81 {approx = true} : vector<16x1xf32> -> vector<16x1xf32>
    %86 = vector.broadcast %85 : vector<16x1xf32> to vector<16x128xf32>
    %87 = arith.mulf %84, %86 : vector<16x128xf32>
    %c4_i32_38 = arith.constant 4 : i32
    %88 = tpu.memref_slice %arg16[%c4_i32_38] : memref<6x!tpu.dma_semaphore, #tpu.memory_space<semaphore_mem>> -> memref<1x!tpu.dma_semaphore, #tpu.memory_space<semaphore_mem>>
    %89 = tpu.memref_squeeze %88 : memref<1x!tpu.dma_semaphore, #tpu.memory_space<semaphore_mem>> -> memref<!tpu.dma_semaphore, #tpu.memory_space<semaphore_mem>>
    tpu.wait_dma2 semaphore(%89 : memref<!tpu.dma_semaphore, #tpu.memory_space<semaphore_mem>>) src(%arg7 : memref<1x36x128xf32, #tpu.memory_space<any>>) dst(%arg14 : memref<1x36x128xf32, #tpu.memory_space<vmem>>)
    %c5_i32_39 = arith.constant 5 : i32
    %90 = tpu.memref_slice %arg16[%c5_i32_39] : memref<6x!tpu.dma_semaphore, #tpu.memory_space<semaphore_mem>> -> memref<1x!tpu.dma_semaphore, #tpu.memory_space<semaphore_mem>>
    %91 = tpu.memref_squeeze %90 : memref<1x!tpu.dma_semaphore, #tpu.memory_space<semaphore_mem>> -> memref<!tpu.dma_semaphore, #tpu.memory_space<semaphore_mem>>
    tpu.wait_dma2 semaphore(%91 : memref<!tpu.dma_semaphore, #tpu.memory_space<semaphore_mem>>) src(%arg8 : memref<1x36x128xf32, #tpu.memory_space<any>>) dst(%arg15 : memref<1x36x128xf32, #tpu.memory_space<vmem>>)
    %c0_40 = arith.constant 0 : index
    %c0_41 = arith.constant 0 : index
    %c0_42 = arith.constant 0 : index
    %92 = vector.load %arg14[%c0_40, %c0_41, %c0_42] : memref<1x36x128xf32, #tpu.memory_space<vmem>>, vector<1x36x128xf32>
    %93 = vector.shape_cast %92 : vector<1x36x128xf32> to vector<36x128xf32>
    %c0_43 = arith.constant 0 : index
    %c0_44 = arith.constant 0 : index
    %c0_45 = arith.constant 0 : index
    %94 = vector.load %arg15[%c0_43, %c0_44, %c0_45] : memref<1x36x128xf32, #tpu.memory_space<vmem>>, vector<1x36x128xf32>
    %95 = vector.shape_cast %94 : vector<1x36x128xf32> to vector<36x128xf32>
    %96 = arith.truncf %87 : vector<16x128xf32> to vector<16x128xbf16>
    %97 = arith.truncf %93 : vector<36x128xf32> to vector<36x128xbf16>
    %cst_46 = arith.constant dense<0.000000e+00> : vector<16x36xf32>
    %98 = tpu.matmul %96, %97, %cst_46 {dimension_numbers = #tpu.dot_dimension_numbers<[1], [1], [0], [0], [0, 0, 1, 0], [], []>} : vector<16x128xbf16>, vector<36x128xbf16>, vector<16x36xf32> -> vector<16x36xf32>
    %cst_47 = arith.constant 0.0883883461 : f32
    %99 = vector.broadcast %cst_47 : f32 to vector<16x36xf32>
    %100 = arith.mulf %98, %99 : vector<16x36xf32>
    %cst_48 = arith.constant dense<0xFF800000> : vector<16xf32>
    %101 = vector.multi_reduction <maximumf>, %100, %cst_48 [1] : vector<16x36xf32> to vector<16xf32>
    %102 = vector.shape_cast %101 : vector<16xf32> to vector<16x1xf32>
    %103 = vector.broadcast %102 : vector<16x1xf32> to vector<16x36xf32>
    %104 = arith.subf %100, %103 : vector<16x36xf32>
    %105 = math.exp %104 : vector<16x36xf32>
    %cst_49 = arith.constant dense<0.000000e+00> : vector<16xf32>
    %106 = vector.multi_reduction <add>, %105, %cst_49 [1] : vector<16x36xf32> to vector<16xf32>
    %107 = vector.shape_cast %106 : vector<16xf32> to vector<16x1xf32>
    %108 = arith.truncf %105 : vector<16x36xf32> to vector<16x36xbf16>
    %109 = arith.truncf %95 : vector<36x128xf32> to vector<36x128xbf16>
    %cst_50 = arith.constant dense<0.000000e+00> : vector<16x128xf32>
    %110 = tpu.matmul %108, %109, %cst_50 {dimension_numbers = #tpu.dot_dimension_numbers<[1], [0], [0], [1], [0, 0, 1, 1], [], []>} : vector<16x36xbf16>, vector<36x128xbf16>, vector<16x128xf32> -> vector<16x128xf32>
    %111 = tpu.reciprocal %107 {approx = true} : vector<16x1xf32> -> vector<16x1xf32>
    %112 = vector.broadcast %111 : vector<16x1xf32> to vector<16x128xf32>
    %113 = arith.mulf %110, %112 : vector<16x128xf32>
    %c0_51 = arith.constant 0 : index
    %c0_52 = arith.constant 0 : index
    %c0_53 = arith.constant 0 : index
    %114 = vector.load %arg9[%c0_51, %c0_52, %c0_53] : memref<1x16x128xf32, #tpu.memory_space<vmem>>, vector<1x16x128xf32>
    %115 = vector.shape_cast %114 : vector<1x16x128xf32> to vector<16x128xf32>
    %116 = vector.shape_cast %113 : vector<16x128xf32> to vector<1x16x128xf32>
    tpu.vector_store %arg9[%c0_51, %c0_52, %c0_53], %116 {strides = array<i32>} : memref<1x16x128xf32, #tpu.memory_space<vmem>>, vector<1x16x128xf32>,
    return
  }
}

</mosaic_0001>

<bundles_post_ra>
// kernel: model_forward.1
= control target key start
LH: loop header
LB: loop body
LE: loop exit
PB: predicated region body
PF: predicated region fallthrough
CT: control target
= control target key end

     0   :  { %14 = vsyncpa [#allocation10], 0  ;;  %s1448_s0 = inlined_call_operand.vmem [shape: f32[1,16,128], index: 0, kind: input, shape index: {}]   ;;  %s1449_s1 = inlined_call_operand.vmem [shape: f32[1,24,128], index: 1, kind: input, shape index: {}]   ;;  %s1450_s2 = inlined_call_operand.vmem [shape: f32[1,24,128], index: 2, kind: input, shape index: {}]   ;;  %s1451_s3 = inlined_call_operand.vmem [shape: f32[1,28,128], index: 3, kind: input, shape index: {}]   ;;  %s1452_s4 = inlined_call_operand.vmem [shape: f32[1,28,128], index: 4, kind: input, shape index: {}]   ;;  %s1453_s5 = inlined_call_operand.vmem [shape: f32[1,32,128], index: 5, kind: input, shape index: {}]   ;;  %s1454_s6 = inlined_call_operand.vmem [shape: f32[1,32,128], index: 6, kind: input, shape index: {}]   ;;  %s1455_s7 = inlined_call_operand.vmem [shape: f32[1,36,128], index: 7, kind: input, shape index: {}]   ;;  %s1456_s8 = inlined_call_operand.vmem [shape: f32[1,36,128], index: 8, kind: input, shape index: {}]   ;;  %s1457_s9 = inlined_call_operand.hbm [shape: f32[1,16,128], index: 9, kind: output, shape index: {}]  }
   0x1   :  { %v59_v0 = vld [vmem:[%s1451_s3] sm:$0xff]  ;;  %v61_v1 = vld [vmem:[%s1451_s3 + $0x8] sm:$0xff]  ;;  %v63_v2 = vld [vmem:[%s1451_s3 + $0x10] sm:$0xff] }
   0x2   :  { %60 = vst [vmem:[#allocation2] sm:$0xff] %v59_v0  ;;  %62 = vst [vmem:[#allocation2 + $0x8] sm:$0xff] %v61_v1  ;;  %v1020_v3 = vld [vmem:[%s1451_s3 + $0x18] sm:$0xf] }
   0x3   :  { %64 = vst [vmem:[#allocation2 + $0x10] sm:$0xff] %v63_v2  ;;  %75 = vst [vmem:[#allocation2 + $0x18] sm:$0xf] %v1020_v3 }
   0x4   :  { %79 = vsyncadd [#allocation8], 448  ;;  %v118_v4 = vld [vmem:[%s1452_s4] sm:$0xff]  ;;  %v120_v5 = vld [vmem:[%s1452_s4 + $0x8] sm:$0xff] }
   0x5   :  { %119 = vst [vmem:[#allocation3] sm:$0xff] %v118_v4  ;;  %121 = vst [vmem:[#allocation3 + $0x8] sm:$0xff] %v120_v5  ;;  %v122_v6 = vld [vmem:[%s1452_s4 + $0x10] sm:$0xff]  ;;  %v1021_v7 = vld [vmem:[%s1452_s4 + $0x18] sm:$0xf] }
   0x6   :  { %123 = vst [vmem:[#allocation3 + $0x10] sm:$0xff] %v122_v6  ;;  %134 = vst [vmem:[#allocation3 + $0x18] sm:$0xf] %v1021_v7 }
   0x7   :  { %138 = vsyncadd [#allocation8 + $0x1], 448  ;;  %v1283_v8 = vld [vmem:[%s1453_s5] sm:$0xff]  ;;  %v1288_v9 = vld [vmem:[%s1453_s5 + $0x8] sm:$0xff] }
   0x8   :  { %v1293_v10 = vld [vmem:[%s1453_s5 + $0x10] sm:$0xff]  ;;  %v1298_v11 = vld [vmem:[%s1453_s5 + $0x18] sm:$0xff] }
   0x9   :  { %187 = vsyncadd [#allocation8 + $0x2], 512  ;;  %v1303_v12 = vld [vmem:[%s1454_s6] sm:$0xff]  ;;  %v1308_v13 = vld [vmem:[%s1454_s6 + $0x8] sm:$0xff] }
   0xa   :  { %v1313_v14 = vld [vmem:[%s1454_s6 + $0x10] sm:$0xff]  ;;  %v1318_v15 = vld [vmem:[%s1454_s6 + $0x18] sm:$0xff] }
   0xb   :  { %236 = vsyncadd [#allocation8 + $0x3], 512  ;;  %v275_v16 = vld [vmem:[%s1455_s7] sm:$0xff]  ;;  %v277_v17 = vld [vmem:[%s1455_s7 + $0x8] sm:$0xff] }
   0xc   :  { %276 = vst [vmem:[#allocation6] sm:$0xff] %v275_v16  ;;  %278 = vst [vmem:[#allocation6 + $0x8] sm:$0xff] %v277_v17  ;;  %v279_v18 = vld [vmem:[%s1455_s7 + $0x10] sm:$0xff]  ;;  %v281_v19 = vld [vmem:[%s1455_s7 + $0x18] sm:$0xff] }
   0xd   :  { %v1022_v20 = vld [vmem:[%s1455_s7 + $0x20] sm:$0xf]  ;;  %280 = vst [vmem:[#allocation6 + $0x10] sm:$0xff] %v279_v18  ;;  %282 = vst [vmem:[#allocation6 + $0x18] sm:$0xff] %v281_v19 }
   0xe   :  { %293 = vst [vmem:[#allocation6 + $0x20] sm:$0xf] %v1022_v20 }
   0xf   :  { %297 = vsyncadd [#allocation8 + $0x4], 576  ;;  %v336_v21 = vld [vmem:[%s1456_s8] sm:$0xff]  ;;  %v338_v22 = vld [vmem:[%s1456_s8 + $0x8] sm:$0xff] }
  0x10   :  { %337 = vst [vmem:[#allocation7] sm:$0xff] %v336_v21  ;;  %339 = vst [vmem:[#allocation7 + $0x8] sm:$0xff] %v338_v22  ;;  %v340_v23 = vld [vmem:[%s1456_s8 + $0x10] sm:$0xff]  ;;  %v342_v24 = vld [vmem:[%s1456_s8 + $0x18] sm:$0xff] }
  0x11   :  { %v1023_v25 = vld [vmem:[%s1456_s8 + $0x20] sm:$0xf]  ;;  %341 = vst [vmem:[#allocation7 + $0x10] sm:$0xff] %v340_v23  ;;  %343 = vst [vmem:[#allocation7 + $0x18] sm:$0xff] %v342_v24 }
  0x12   :  { %354 = vst [vmem:[#allocation7 + $0x20] sm:$0xf] %v1023_v25 }
  0x13   :  { %358 = vsyncadd [#allocation8 + $0x5], 576  ;;  %v361_v26 = vld [vmem:[%s1449_s1] sm:$0xff]  ;;  %v362_v27 = vld [vmem:[%s1449_s1 + $0x8] sm:$0xff]  ;;  %v1201_v28 = vmov 0.0   ;;  %vm1202_vm0 = vmmov 0  }
  0x14   :  { %1060 = vmatprep.subr.bf16.mxu0 %v1201_v28  ;;  %v368_v29 = vpack.c.bf16 %v362_v27, %v361_v26  ;;  %1064 = vmatprep.mubr.msk.bf16.mxu0 %vm1202_vm0, %v1201_v28  ;;  %v363_v30 = vld [vmem:[%s1449_s1 + $0x10] sm:$0xff]  ;;  %v359_v32 = vld [vmem:[%s1448_s0] sm:$0xff]  ;;  %v360_v33 = vld [vmem:[%s1448_s0 + $0x8] sm:$0xff]  ;;  %vm413_vm1 = vcmask 195584   ;;  %vm438_vm2 = vcmask 1043456  }
  0x15   :  { %1068 = vmatprep.subr.bf16.mxu1 %v1201_v28  ;;  %1072 = vmatprep.mubr.msk.bf16.mxu1 %vm1202_vm0, %v1201_v28  ;;  %v369_v31 = vpack.c.bf16 %v363_v30, %v363_v30  ;;  %v367_v34 = vpack.c.bf16 %v360_v33, %v359_v32  ;;  %v364_v43 = vld [vmem:[%s1450_s2] sm:$0xff]  ;;  %v365_v44 = vld [vmem:[%s1450_s2 + $0x8] sm:$0xff]  ;;  %v366_v46 = vld [vmem:[%s1450_s2 + $0x10] sm:$0xff] }
  0x16   :  { %1061 = vmatpush3.bf16.xpose.msra.mxu0 %v368_v29  ;;  %v433_v45 = vpack.c.bf16 %v365_v44, %v364_v43  ;;  %v434_v47 = vpack.c.bf16 %v366_v46, %v366_v46 }
  0x17   :  { %1062 = vmatprep.subr.bf16.mxu0 %v1201_v28 }
  0x18   :  { %1069 = vmatpush3.bf16.msra.mxu1 %v433_v45  ;;  %v440_v48 = vsel %vm438_vm2, %v434_v47, 0 }
  0x19   :  { %1070 = vmatprep.subr.bf16.mxu1 %v1201_v28 }
  0x1c   :  { %1071 = vmatpush3.bf16.msra.mxu1 %v440_v48 }
  0x1e   :  { %1063 = vmatpush3.bf16.xpose.msra.mxu0 %v369_v31 }
  0x25   :  { %1065 = vmatmul.mubr.bf16.vlgmr.msra.gmra.mrb[0].mxu0 %v367_v34 }
  0xf8   :  { %v404_v35 = vpop.f32.mrb[0].mxu0 }
  0xf9   :  { %v411_v36 = vmul.f32 0.088388346, %v404_v35  ;;  %v1066_v37 = vpop.f32.mrb[1].mxu0 }
  0xfa   :  { %v407_v38 = vpop.f32.mrb[2].mxu0 }
  0xfb   :  { %v412_v39 = vmul.f32 0.088388346, %v407_v38  ;;  %v1067_v40 = vpop.f32.mrb[3].mxu0  ;;  %v414_v41 = vsel %vm413_vm1, %v411_v36, -inf }
  0xfc   :  { %415 = vmax.xlane.f32.xlu0 %v414_v41 }
  0xfd   :  { %v417_v42 = vsel %vm413_vm1, %v412_v39, -inf }
 0x100   :  { %418 = vmax.xlane.f32.xlu0 %v417_v42 }
 0x189   :  { %v416_v49 = vpop.xlane.xlu0 %415 }
 0x18a   :  { %v420_v50 = vsub.f32 %v411_v36, %v416_v49 }
 0x18c   :  { %v422_v51 = vmul.f32 1.442695, %v420_v50 }
 0x18d   :  { %v419_v52 = vpop.xlane.xlu0 %418 }
 0x18e   :  { %1133 = vpow2.f32 %v422_v51  ;;  %v421_v53 = vsub.f32 %v412_v39, %v419_v52 }
 0x190   :  { %v424_v54 = vmul.f32 1.442695, %v421_v53 }
 0x192   :  { %1135 = vpow2.f32 %v424_v54 }
 0x198   :  { %v1134_v55 = vpop.eup %1133 }
 0x199   :  { %v426_v56 = vsel %vm413_vm1, %v1134_v55, 0.0 }
 0x19a   :  { %427 = vadd.xlane.f32.xlu1 %v426_v56 }
 0x19c   :  { %v1136_v57 = vpop.eup %1135 }
 0x19d   :  { %v429_v58 = vsel %vm413_vm1, %v1136_v57, 0.0  ;;  %v432_v59 = vpack.c.bf16 %v1136_v57, %v1134_v55 }
 0x19e   :  { %430 = vadd.xlane.f32.xlu1 %v429_v58 }
 0x19f   :  { %1073 = vmatmul.mubr.msk.bf16.vlgmr.msra.gmra.mrb[0].mxu1 %vm413_vm1, %v432_v59 }
 0x227   :  { %v428_v60 = vpop.xlane.xlu1 %427 }
 0x228   :  { %1137 = vrcp.f32 %v428_v60 }
 0x22b   :  { %v431_v61 = vpop.xlane.xlu1 %430 }
 0x22c   :  { %1139 = vrcp.f32 %v431_v61 }
 0x232   :  { %v1138_v62 = vpop.eup %1137 }
 0x236   :  { %v1140_v2 = vpop.eup %1139 }
 0x272   :  { %v476_v63 = vpop.f32.mrb[0].mxu1 }
 0x273   :  { %v485_v0 = vmul.f32 %v1138_v62, %v476_v63  ;;  %v1074_v1 = vpop.f32.mrb[1].mxu1 }
 0x274   :  { %v479_v3 = vpop.f32.mrb[2].mxu1 }
 0x275   :  { %v486_v4 = vmul.f32 %v1140_v2, %v479_v3  ;;  %v1075_v5 = vpop.f32.mrb[3].mxu1 }
 0x276   :  { %1187 = dma.done.wait [#allocation8], 448 }
 0x277   :  { %1188 = vsyncadd [#allocation8], 4294966848 }
 0x278   :  { %1189 = dma.done.wait [#allocation8 + $0x1], 448 }
 0x279   :  { %1190 = vsyncadd [#allocation8 + $0x1], 4294966848  ;;  %1076 = vmatprep.subr.bf16.mxu1 %v1201_v28  ;;  %1080 = vmatprep.mubr.msk.bf16.mxu1 %vm1202_vm0, %v1201_v28  ;;  %v493_v6 = vld [vmem:[#allocation2] sm:$0xff]  ;;  %v494_v7 = vld [vmem:[#allocation2 + $0x8] sm:$0xff]  ;;  %v501_v20 = vpack.c.bf16 %v486_v4, %v485_v0  ;;  %vm547_vm3 = vcmask 228352   ;;  %vm572_vm4 = vcmask 1045504  }
 0x27a   :  { %1084 = vmatprep.subr.bf16.mxu0 %v1201_v28  ;;  %1088 = vmatprep.mubr.msk.bf16.mxu0 %vm1202_vm0, %v1201_v28  ;;  %v502_v16 = vpack.c.bf16 %v494_v7, %v493_v6  ;;  %v495_v17 = vld [vmem:[#allocation2 + $0x10] sm:$0xff]  ;;  %v496_v18 = vld [vmem:[#allocation2 + $0x18] sm:$0xf]  ;;  %v497_v30 = vld [vmem:[#allocation3] sm:$0xff] }
 0x27b   :  { %v503_v19 = vpack.c.bf16 %v496_v18, %v495_v17  ;;  %v498_v31 = vld [vmem:[#allocation3 + $0x8] sm:$0xff]  ;;  %v499_v33 = vld [vmem:[#allocation3 + $0x10] sm:$0xff]  ;;  %v500_v34 = vld [vmem:[#allocation3 + $0x18] sm:$0xf] }
 0x27c   :  { %1077 = vmatpush3.bf16.xpose.msra.mxu1 %v502_v16  ;;  %v567_v32 = vpack.c.bf16 %v498_v31, %v497_v30  ;;  %v568_v35 = vpack.c.bf16 %v500_v34, %v499_v33 }
 0x27d   :  { %1078 = vmatprep.subr.bf16.mxu1 %v1201_v28 }
 0x27e   :  { %1085 = vmatpush3.bf16.msra.mxu0 %v567_v32  ;;  %v574_v36 = vsel %vm572_vm4, %v568_v35, 0 }
 0x27f   :  { %1086 = vmatprep.subr.bf16.mxu0 %v1201_v28 }
 0x282   :  { %1087 = vmatpush3.bf16.msra.mxu0 %v574_v36 }
 0x284   :  { %1079 = vmatpush3.bf16.xpose.msra.mxu1 %v503_v19 }
 0x28b   :  { %1081 = vmatmul.mubr.bf16.vlgmr.msra.gmra.mrb[4].mxu1 %v501_v20 }
 0x35e   :  { %v538_v21 = vpop.f32.mrb[4].mxu1 }
 0x35f   :  { %v545_v22 = vmul.f32 0.088388346, %v538_v21  ;;  %v1082_v23 = vpop.f32.mrb[5].mxu1 }
 0x360   :  { %v541_v24 = vpop.f32.mrb[6].mxu1 }
 0x361   :  { %v546_v25 = vmul.f32 0.088388346, %v541_v24  ;;  %v1083_v26 = vpop.f32.mrb[7].mxu1  ;;  %v548_v27 = vsel %vm547_vm3, %v545_v22, -inf }
 0x362   :  { %549 = vmax.xlane.f32.xlu0 %v548_v27 }
 0x363   :  { %v551_v29 = vsel %vm547_vm3, %v546_v25, -inf }
 0x366   :  { %552 = vmax.xlane.f32.xlu0 %v551_v29 }
 0x3ef   :  { %v550_v37 = vpop.xlane.xlu0 %549 }
 0x3f0   :  { %v554_v38 = vsub.f32 %v545_v22, %v550_v37 }
 0x3f2   :  { %v556_v39 = vmul.f32 1.442695, %v554_v38 }
 0x3f3   :  { %v553_v40 = vpop.xlane.xlu0 %552 }
 0x3f4   :  { %1141 = vpow2.f32 %v556_v39  ;;  %v555_v41 = vsub.f32 %v546_v25, %v553_v40 }
 0x3f6   :  { %v558_v42 = vmul.f32 1.442695, %v555_v41 }
 0x3f8   :  { %1143 = vpow2.f32 %v558_v42 }
 0x3fe   :  { %v1142_v43 = vpop.eup %1141 }
 0x3ff   :  { %v560_v44 = vsel %vm547_vm3, %v1142_v43, 0.0 }
 0x400   :  { %561 = vadd.xlane.f32.xlu1 %v560_v44 }
 0x402   :  { %v1144_v45 = vpop.eup %1143 }
 0x403   :  { %v563_v46 = vsel %vm547_vm3, %v1144_v45, 0.0  ;;  %v566_v47 = vpack.c.bf16 %v1144_v45, %v1142_v43 }
 0x404   :  { %564 = vadd.xlane.f32.xlu1 %v563_v46 }
 0x405   :  { %1089 = vmatmul.mubr.msk.bf16.vlgmr.msra.gmra.mrb[4].mxu0 %vm547_vm3, %v566_v47 }
 0x48d   :  { %v562_v48 = vpop.xlane.xlu1 %561 }
 0x48e   :  { %1145 = vrcp.f32 %v562_v48 }
 0x491   :  { %v565_v49 = vpop.xlane.xlu1 %564 }
 0x492   :  { %1147 = vrcp.f32 %v565_v49 }
 0x498   :  { %v1146_v50 = vpop.eup %1145 }
 0x49c   :  { %v1148_v54 = vpop.eup %1147 }
 0x4d8   :  { %v610_v51 = vpop.f32.mrb[4].mxu0 }
 0x4d9   :  { %v619_v52 = vmul.f32 %v1146_v50, %v610_v51  ;;  %v1090_v53 = vpop.f32.mrb[5].mxu0 }
 0x4da   :  { %v613_v55 = vpop.f32.mrb[6].mxu0 }
 0x4db   :  { %v620_v56 = vmul.f32 %v1148_v54, %v613_v55  ;;  %v1091_v57 = vpop.f32.mrb[7].mxu0 }
 0x4dc   :  { %1191 = dma.done.wait [#allocation8 + $0x2], 512 }
 0x4dd   :  { %1192 = vsyncadd [#allocation8 + $0x2], 4294966784  ;;  %1092 = vmatprep.subr.bf16.mxu0 %v1201_v28  ;;  %v636_v58 = vpack.c.bf16 %v1288_v9, %v1283_v8  ;;  %1096 = vmatprep.mubr.msk.bf16.mxu0 %vm1202_vm0, %v1201_v28 }
 0x4de   :  { %1193 = dma.done.wait [#allocation8 + $0x3], 512 }
 0x4df   :  { %1194 = vsyncadd [#allocation8 + $0x3], 4294966784  ;;  %1100 = vmatprep.subr.bf16.mxu1 %v1201_v28  ;;  %1104 = vmatprep.mubr.msk.bf16.mxu1 %vm1202_vm0, %v1201_v28  ;;  %v637_v59 = vpack.c.bf16 %v1298_v11, %v1293_v10  ;;  %v635_v60 = vpack.c.bf16 %v620_v56, %v619_v52  ;;  %vm681_vm5 = vcmask 261120   ;;  %v701_v3 = vpack.c.bf16 %v1308_v13, %v1303_v12 }
 0x4e0   :  { %1093 = vmatpush3.bf16.xpose.msra.mxu0 %v636_v58  ;;  %v702_v10 = vpack.c.bf16 %v1318_v15, %v1313_v14 }
 0x4e1   :  { %1094 = vmatprep.subr.bf16.mxu0 %v1201_v28  ;;  %1101 = vmatpush3.bf16.msra.mxu1 %v701_v3 }
 0x4e2   :  { %1102 = vmatprep.subr.bf16.mxu1 %v1201_v28 }
 0x4e5   :  { %1103 = vmatpush3.bf16.msra.mxu1 %v702_v10 }
 0x4e8   :  { %1095 = vmatpush3.bf16.xpose.msra.mxu0 %v637_v59 }
 0x4ef   :  { %1097 = vmatmul.mubr.bf16.vlgmr.msra.gmra.mrb[8].mxu0 %v635_v60 }
 0x5c2   :  { %v672_v8 = vpop.f32.mrb[8].mxu0 }
 0x5c3   :  { %v679_v9 = vmul.f32 0.088388346, %v672_v8  ;;  %v1098_v61 = vpop.f32.mrb[9].mxu0 }
 0x5c4   :  { %v675_v62 = vpop.f32.mrb[10].mxu0 }
 0x5c5   :  { %v680_v63 = vmul.f32 0.088388346, %v675_v62  ;;  %v1099_v0 = vpop.f32.mrb[11].mxu0  ;;  %v682_v1 = vsel %vm681_vm5, %v679_v9, -inf }
 0x5c6   :  { %683 = vmax.xlane.f32.xlu0 %v682_v1 }
 0x5c7   :  { %v685_v2 = vsel %vm681_vm5, %v680_v63, -inf }
 0x5ca   :  { %686 = vmax.xlane.f32.xlu0 %v685_v2 }
 0x653   :  { %v684_v11 = vpop.xlane.xlu0 %683 }
 0x654   :  { %v688_v4 = vsub.f32 %v679_v9, %v684_v11 }
 0x656   :  { %v690_v5 = vmul.f32 1.442695, %v688_v4 }
 0x657   :  { %v687_v6 = vpop.xlane.xlu0 %686 }
 0x658   :  { %1149 = vpow2.f32 %v690_v5  ;;  %v689_v7 = vsub.f32 %v680_v63, %v687_v6 }
 0x65a   :  { %v692_v16 = vmul.f32 1.442695, %v689_v7 }
 0x65c   :  { %1151 = vpow2.f32 %v692_v16 }
 0x662   :  { %v1150_v17 = vpop.eup %1149 }
 0x663   :  { %v694_v18 = vsel %vm681_vm5, %v1150_v17, 0.0 }
 0x664   :  { %695 = vadd.xlane.f32.xlu1 %v694_v18 }
 0x666   :  { %v1152_v12 = vpop.eup %1151 }
 0x667   :  { %v697_v13 = vsel %vm681_vm5, %v1152_v12, 0.0  ;;  %v700_v19 = vpack.c.bf16 %v1152_v12, %v1150_v17 }
 0x668   :  { %698 = vadd.xlane.f32.xlu1 %v697_v13 }
 0x669   :  { %1105 = vmatmul.mubr.msk.bf16.vlgmr.msra.gmra.mrb[8].mxu1 %vm681_vm5, %v700_v19 }
 0x6f1   :  { %v696_v14 = vpop.xlane.xlu1 %695 }
 0x6f2   :  { %1153 = vrcp.f32 %v696_v14 }
 0x6f5   :  { %v699_v15 = vpop.xlane.xlu1 %698 }
 0x6f6   :  { %1155 = vrcp.f32 %v699_v15 }
 0x6fc   :  { %v1154_v20 = vpop.eup %1153 }
 0x700   :  { %v1156_v24 = vpop.eup %1155 }
 0x73c   :  { %v740_v21 = vpop.f32.mrb[8].mxu1 }
 0x73d   :  { %v749_v22 = vmul.f32 %v1154_v20, %v740_v21  ;;  %v1106_v23 = vpop.f32.mrb[9].mxu1 }
 0x73e   :  { %v743_v25 = vpop.f32.mrb[10].mxu1 }
 0x73f   :  { %v750_v26 = vmul.f32 %v1156_v24, %v743_v25  ;;  %v1107_v27 = vpop.f32.mrb[11].mxu1 }
 0x740   :  { %1195 = dma.done.wait [#allocation8 + $0x4], 576 }
 0x741   :  { %1196 = vsyncadd [#allocation8 + $0x4], 4294966720 }
 0x742   :  { %1197 = dma.done.wait [#allocation8 + $0x5], 576 }
 0x743   :  { %1198 = vsyncadd [#allocation8 + $0x5], 4294966720  ;;  %1108 = vmatprep.subr.bf16.mxu1 %v1201_v28  ;;  %1114 = vmatprep.mubr.msk.bf16.mxu1 %vm1202_vm0, %v1201_v28  ;;  %v757_v29 = vld [vmem:[#allocation6] sm:$0xff]  ;;  %v758_v30 = vld [vmem:[#allocation6 + $0x8] sm:$0xff]  ;;  %v767_v37 = vpack.c.bf16 %v750_v26, %v749_v22  ;;  %vm814_vm6 = vcmask 293888   ;;  %vm840_vm7 = vcmask 1041408  }
 0x744   :  { %1118 = vmatprep.subr.bf16.mxu0 %v1201_v28  ;;  %1124 = vmatprep.mubr.msk.bf16.mxu0 %vm1202_vm0, %v1201_v28  ;;  %v768_v31 = vpack.c.bf16 %v758_v30, %v757_v29  ;;  %v759_v32 = vld [vmem:[#allocation6 + $0x10] sm:$0xff]  ;;  %v760_v33 = vld [vmem:[#allocation6 + $0x18] sm:$0xff]  ;;  %v761_v35 = vld [vmem:[#allocation6 + $0x20] sm:$0xf]  ;;  %s1203_s2 = smov [#allocation9]  }
 0x745   :  { %v769_v34 = vpack.c.bf16 %v760_v33, %v759_v32  ;;  %v770_v36 = vpack.c.bf16 %v761_v35, %v761_v35  ;;  %v762_v46 = vld [vmem:[#allocation7] sm:$0xff]  ;;  %v763_v47 = vld [vmem:[#allocation7 + $0x8] sm:$0xff]  ;;  %v764_v49 = vld [vmem:[#allocation7 + $0x10] sm:$0xff]  ;;  %s896_s24 = sshll.u32 %s1203_s2, 4  ;;  %s897_s24 = int_to_ptr.vmem [resolvable:$true] %s896_s24 }
 0x746   :  { %1109 = vmatpush3.bf16.xpose.msra.mxu1 %v768_v31  ;;  %v834_v48 = vpack.c.bf16 %v763_v47, %v762_v46  ;;  %v765_v50 = vld [vmem:[#allocation7 + $0x18] sm:$0xff]  ;;  %v766_v52 = vld [vmem:[#allocation7 + $0x20] sm:$0xf]  ;;  %s1165_s6 = scalar_lea.vmem %s897_s24, 256  ;;  %p1170_p1 = scmp.lt.s32.totalorder %s897_s24, %s897_s24 }
 0x747   :  { %1110 = vmatprep.subr.bf16.mxu1 %v1201_v28  ;;  %v835_v51 = vpack.c.bf16 %v765_v50, %v764_v49  ;;  %v836_v53 = vpack.c.bf16 %v766_v52, %v766_v52  ;;  %p1166_p0 = scmp.ne.s32.totalorder %s897_s24, %s1165_s6  ;;  %p1171_p2 = scmp.lt.s32.totalorder %s1165_s6, %s1165_s6 }
 0x748   :  { %1119 = vmatpush3.bf16.msra.mxu0 %v834_v48 }
 0x749   :  { %1120 = vmatprep.subr.bf16.mxu0 %v1201_v28  ;;  %v842_v54 = vsel %vm840_vm7, %v836_v53, 0  ;;  %p1172_p3 = por %p1171_p2, %p1170_p1 }
 0x74b   :  { %p1173_p4 = pnand %p1172_p3, %p1166_p0 }
 0x74c   :  { %1121 = vmatpush3.bf16.msra.mxu0 %v835_v51 }
 0x74d   :  { %1122 = vmatprep.subr.bf16.mxu0 %v1201_v28 }
 0x74e   :  { %1111 = vmatpush3.bf16.xpose.msra.mxu1 %v769_v34 }
 0x74f   :  { %1112 = vmatprep.subr.bf16.mxu1 %v1201_v28 }
 0x750   :  { %1123 = vmatpush3.bf16.msra.mxu0 %v842_v54 }
 0x756   :  { %1113 = vmatpush3.bf16.xpose.msra.mxu1 %v770_v36 }
 0x75d   :  { %1115 = vmatmul.mubr.bf16.vlgmr.msra.gmra.mrb[12].mxu1 %v767_v37 }
 0x830   :  { %v805_v38 = vpop.f32.mrb[12].mxu1 }
 0x831   :  { %v812_v39 = vmul.f32 0.088388346, %v805_v38  ;;  %v1116_v40 = vpop.f32.mrb[13].mxu1 }
 0x832   :  { %v808_v41 = vpop.f32.mrb[14].mxu1 }
 0x833   :  { %v813_v42 = vmul.f32 0.088388346, %v808_v41  ;;  %v1117_v43 = vpop.f32.mrb[15].mxu1  ;;  %v815_v44 = vsel %vm814_vm6, %v812_v39, -inf }
 0x834   :  { %816 = vmax.xlane.f32.xlu0 %v815_v44 }
 0x835   :  { %v818_v45 = vsel %vm814_vm6, %v813_v42, -inf }
 0x838   :  { %819 = vmax.xlane.f32.xlu0 %v818_v45 }
 0x8c1   :  { %v817_v55 = vpop.xlane.xlu0 %816 }
 0x8c2   :  { %v821_v56 = vsub.f32 %v812_v39, %v817_v55 }
 0x8c4   :  { %v823_v57 = vmul.f32 1.442695, %v821_v56 }
 0x8c5   :  { %v820_v58 = vpop.xlane.xlu0 %819 }
 0x8c6   :  { %1157 = vpow2.f32 %v823_v57  ;;  %v822_v59 = vsub.f32 %v813_v42, %v820_v58 }
 0x8c8   :  { %v825_v60 = vmul.f32 1.442695, %v822_v59 }
 0x8ca   :  { %1159 = vpow2.f32 %v825_v60 }
 0x8d0   :  { %v1158_v8 = vpop.eup %1157 }
 0x8d1   :  { %v827_v9 = vsel %vm814_vm6, %v1158_v8, 0.0 }
 0x8d2   :  { %828 = vadd.xlane.f32.xlu1 %v827_v9 }
 0x8d4   :  { %v1160_v61 = vpop.eup %1159 }
 0x8d5   :  { %v830_v62 = vsel %vm814_vm6, %v1160_v61, 0.0  ;;  %v833_v28 = vpack.c.bf16 %v1160_v61, %v1158_v8 }
 0x8d6   :  { %831 = vadd.xlane.f32.xlu1 %v830_v62 }
 0x8d7   :  { %1125 = vmatmul.mubr.msk.bf16.vlgmr.msra.gmra.mrb[12].mxu0 %vm814_vm6, %v833_v28 }
 0x95f   :  { %v829_v63 = vpop.xlane.xlu1 %828 }
 0x960   :  { %1161 = vrcp.f32 %v829_v63 }
 0x963   :  { %v832_v0 = vpop.xlane.xlu1 %831 }
 0x964   :  { %1163 = vrcp.f32 %v832_v0 }
 0x96a   :  { %v1162_v1 = vpop.eup %1161 }
 0x96e   :  { %v1164_v11 = vpop.eup %1163 }
 0x9aa   :  { %v878_v2 = vpop.f32.mrb[12].mxu0 }
 0x9ab   :  { %v887_v3 = vmul.f32 %v1162_v1, %v878_v2  ;;  %v1126_v10 = vpop.f32.mrb[13].mxu0 }
 0x9ac   :  { %v881_v4 = vpop.f32.mrb[14].mxu0 }
 0x9ad   :  { %889 = vst [vmem:[#allocation9] sm:$0xff] %v887_v3  ;;  %v888_v5 = vmul.f32 %v1164_v11, %v881_v4  ;;  %v1127_v6 = vpop.f32.mrb[15].mxu0 }
 0x9af   :  { %890 = vst [vmem:[#allocation9 + $0x8] sm:$0xff] %v888_v5 }
 0x9b0   :  { %1176 = shalt.err (!%p1173_p4)
}
 0x9b1   :  { %s1177_s26 = scalar_lea.hbm %s1457_s9, 256 }
 0x9b2   :  { %p1178_p5 = scmp.ne.s32.totalorder %s1457_s9, %s1177_s26  ;;  %p1181_p6 = scmp.lt.u32.totalorder %s1177_s26, %s1457_s9 }
 0x9b4   :  { %p1183_p7 = pnand %p1181_p6, %p1178_p5 }
 0x9b6   :  { %1186 = shalt.err (!%p1183_p7)
}
 0x9b7   :  { %s1204_s4 = smov 128   ;;  %s1205_s7 = smov 8  }
 0x9b8   :  { %902 = dma.vmem_to_hbm [thread:$0]  %s897_s24, 256, %s1457_s9, [#allocation10], %s1204_s4, %s1204_s4, %s1205_s7  }
 0x9b9   :  { %1199 = dma.done.wait [#allocation10], 256  }
 0x9ba   :  { %1200 = vsyncadd [#allocation10], 4294967040 }
 0x9bb   :  { %906 = vsyncpa [#allocation10], 1 }
 0x9bc   :  { %907 = vsyncmov [#allocation8] }
 0x9bf   :  { %s908_s12 = vpop.sfrf %907 }
 0x9c0   :  { %p1028_p8 = scmp.ne.s32.totalorder %s908_s12, 0 }
 0x9c2   :  { %912 = shalt.err (%p1028_p8)  }
 0x9c3   :  { %914 = vsyncmov [#allocation8 + $0x1] }
 0x9c6   :  { %s915_s13 = vpop.sfrf %914 }
 0x9c7   :  { %p1029_p9 = scmp.ne.s32.totalorder %s915_s13, 0 }
 0x9c9   :  { %919 = shalt.err (%p1029_p9)  }
 0x9ca   :  { %921 = vsyncmov [#allocation8 + $0x2] }
 0x9cd   :  { %s922_s14 = vpop.sfrf %921 }
 0x9ce   :  { %p1030_p10 = scmp.ne.s32.totalorder %s922_s14, 0 }
 0x9d0   :  { %926 = shalt.err (%p1030_p10)  }
 0x9d1   :  { %928 = vsyncmov [#allocation8 + $0x3] }
 0x9d4   :  { %s929_s15 = vpop.sfrf %928 }
 0x9d5   :  { %p1031_p11 = scmp.ne.s32.totalorder %s929_s15, 0 }
 0x9d7   :  { %933 = shalt.err (%p1031_p11)  }
 0x9d8   :  { %935 = vsyncmov [#allocation8 + $0x4] }
 0x9db   :  { %s936_s9 = vpop.sfrf %935 }
 0x9dc   :  { %p1032_p12 = scmp.ne.s32.totalorder %s936_s9, 0 }
 0x9de   :  { %940 = shalt.err (%p1032_p12)  }
 0x9df   :  { %942 = vsyncmov [#allocation8 + $0x5] }
 0x9e2   :  { %s943_s8 = vpop.sfrf %942 }
 0x9e3   :  { %p1033_p13 = scmp.ne.s32.totalorder %s943_s8, 0 }
 0x9e5   :  { %947 = shalt.err (%p1033_p13)  }

</bundles_post_ra>
